<compile_context>
chip_gen: v5e
topology: v5e:2x2
jax: 0.10.0
libtpu: 0.0.40
codegen_flags: <defaults>
</compile_context>

<pallas_src>
import functools

import jax
import jax.numpy as jnp
from jax import lax
from jax.experimental import pallas as pl
from jax.experimental.pallas import tpu as pltpu

NEG_SLOPE = 0.01  # torch.nn.functional.leaky_relu default negative_slope


def _round_up(v, m):
    return ((v + m - 1) // m) * m


# ---------------------------------------------------------------------------
# Fused kernel: whole forward for one batch tile, activations stay on-chip.
# ---------------------------------------------------------------------------
def _fused_eagernet_kernel(n_layers, l_pad,
                           x_ref, wb_ref, bb_ref, wm_ref, bmid_ref,
                           we_ref, be_ref,
                           logits_ref, hid_ref):
    x = x_ref[...]  # native dtype straight into the MXU (f32 accumulate below)

    # --- beginning layer: one combined dot, 128-aligned lane split ----------
    y = jnp.dot(x, wb_ref[...], preferred_element_type=jnp.float32) + bb_ref[...]
    hl, o = y[:, :l_pad], y[:, l_pad:]
    h = jnp.maximum(hl, NEG_SLOPE * hl)          # leaky_relu (mul+max)
    logits_ref[0] = o.astype(logits_ref.dtype)
    hid_ref[0] = h.astype(hid_ref.dtype)

    # --- middle layers -------------------------------------------------------
    def layer(l, h_in):
        y = jnp.dot(h_in, wm_ref[l], preferred_element_type=jnp.float32) + bmid_ref[l]
        hl, o = y[:, :l_pad], y[:, l_pad:]
        h_new = jnp.maximum(hl, NEG_SLOPE * hl)
        logits_ref[l + 1] = o.astype(logits_ref.dtype)
        hid_ref[l + 1] = h_new.astype(hid_ref.dtype)
        return h_new

    if n_layers >= 16:
        # Deep config: keep code compact; dynamic leading-axis ref indexing.
        h = lax.fori_loop(0, n_layers, layer, h)
    else:
        for l in range(n_layers):
            h = layer(l, h)

    # --- end layer ------------------------------------------------------------
    o_end = jnp.dot(h, we_ref[...], preferred_element_type=jnp.float32) + be_ref[...]
    logits_ref[n_layers + 1] = o_end.astype(logits_ref.dtype)


# ---------------------------------------------------------------------------
# Wrapper
# ---------------------------------------------------------------------------
def eagernet_forward(params, x, n_output, layer_size, block_batch=512):
    """Matches EagerNet.forward: returns (all_outputs, all_xs)."""
    n_layers = len(params["middle"])
    assert n_layers >= 1, "fused kernel expects at least one middle layer"
    B, n_input = x.shape
    dtype = x.dtype

    L_pad = _round_up(max(layer_size, 1), 128)     # lane-dense hidden width
    OUT_PAD = _round_up(max(n_output, 1), 128)     # lane-dense logits width

    def pad_last(a, tgt):
        p = tgt - a.shape[-1]
        return a if p == 0 else jnp.pad(a, [(0, 0)] * (a.ndim - 1) + [(0, p)])

    # --- weight prep: merge (hidden | output) halves, lane/row pad with zeros.
    wb, bb = params["beginning"]
    wb_c = jnp.concatenate([pad_last(wb[:, :layer_size], L_pad),
                            pad_last(wb[:, layer_size:], OUT_PAD)], axis=1)
    bb_c = jnp.concatenate([pad_last(bb[:, :layer_size], L_pad),
                            pad_last(bb[:, layer_size:], OUT_PAD)], axis=1)

    def merge_mid(w, b):
        wc = jnp.concatenate([pad_last(w[:, :layer_size], L_pad),
                              pad_last(w[:, layer_size:], OUT_PAD)], axis=1)
        wc = jnp.pad(wc, ((0, L_pad - layer_size), (0, 0)))   # zero K rows
        bc = jnp.concatenate([pad_last(b[:, :layer_size], L_pad),
                              pad_last(b[:, layer_size:], OUT_PAD)], axis=1)
        return wc, bc

    merged = [merge_mid(w, b) for (w, b) in params["middle"]]
    wm = jnp.stack([m[0] for m in merged])         # (n_layers, L_pad, L_pad+OUT_PAD)
    bmid = jnp.stack([m[1] for m in merged])       # (n_layers, 1,     L_pad+OUT_PAD)

    we, be = params["end"]
    we_p = jnp.pad(we, ((0, L_pad - layer_size), (0, OUT_PAD - n_output)))
    be_p = pad_last(be, OUT_PAD)

    # --- batch tiling + VMEM budget ------------------------------------------
    itemsize = jnp.dtype(dtype).itemsize
    weight_bytes = sum(int(a.size) * a.dtype.itemsize
                       for a in (wb_c, bb_c, wm, bmid, we_p, be_p))

    def step_bytes(bm_):  # streamed (double-buffered) per-step blocks
        x_b = bm_ * n_input * itemsize
        lg_b = (n_layers + 2) * bm_ * OUT_PAD * itemsize
        hd_b = (n_layers + 1) * bm_ * L_pad * itemsize
        return 2 * (x_b + lg_b + hd_b)

    bm = min(block_batch, B)
    if bm < B:
        bm = _round_up(bm, 8)
    VMEM_BUDGET = 48 << 20           # stay well under v7x's 64 MiB physical
    while bm > 8 and step_bytes(bm) + weight_bytes > VMEM_BUDGET:
        bm = max(8, _round_up(bm // 2, 8))
    # Megacore (v7x): make sure the "parallel" batch axis has >= 2 grid steps.
    if bm == B and B >= 16:
        bm = _round_up((B + 1) // 2, 8)
    n_blocks = pl.cdiv(B, bm)

    vmem_limit = int(min(64 << 20,
                         max(32 << 20, int(1.25 * (step_bytes(bm) + weight_bytes)) + (4 << 20))))

    kernel = functools.partial(_fused_eagernet_kernel, n_layers, L_pad)
    resident_arrays = (wb_c, bb_c, wm, bmid, we_p, be_p)

    def resident_spec(arr, single_buffer):
        nd = arr.ndim
        kwargs = {}
        if single_buffer:
            # Constant index_map => never re-fetched; single buffer saves VMEM.
            kwargs["pipeline_mode"] = pl.Buffered(1)
        return pl.BlockSpec(arr.shape, lambda i, _nd=nd: (0,) * _nd, **kwargs)

    def run(single_buffer_weights):
        in_specs = [pl.BlockSpec((bm, n_input), lambda i: (i, 0))] + [
            resident_spec(a, single_buffer_weights) for a in resident_arrays]
        return pl.pallas_call(
            kernel,
            out_shape=(
                jax.ShapeDtypeStruct((n_layers + 2, B, OUT_PAD), dtype),
                jax.ShapeDtypeStruct((n_layers + 1, B, L_pad), dtype),
            ),
            grid=(n_blocks,),
            in_specs=in_specs,
            out_specs=(
                pl.BlockSpec((n_layers + 2, bm, OUT_PAD), lambda i: (0, i, 0)),
                pl.BlockSpec((n_layers + 1, bm, L_pad), lambda i: (0, i, 0)),
            ),
            compiler_params=pltpu.CompilerParams(
                dimension_semantics=("parallel",),
                vmem_limit_bytes=vmem_limit),
        )(x, *resident_arrays)

    try:
        logits, hiddens = run(True)
    except Exception:
        # Fallback: identical kernel, default double-buffered resident weights.
        logits, hiddens = run(False)

    # Strip lane padding (layout plumbing only).
    all_outputs = [logits[l, :, :n_output] for l in range(n_layers + 2)]
    all_xs = [x] + [hiddens[l, :, :layer_size] for l in range(n_layers + 1)]
    return all_outputs, all_xs


# ---------------------------------------------------------------------------
# Parameter init (mimics torch.nn.Linear default U[-1/sqrt(fan_in), ...])
# ---------------------------------------------------------------------------
def init_eagernet_params(key, n_input, n_output, n_layers, layer_size,
                         dtype=jnp.float32):
    def linear_init(k, fan_in, fan_out):
        kw, kb = jax.random.split(k)
        bound = 1.0 / jnp.sqrt(jnp.float32(fan_in))
        w = jax.random.uniform(kw, (fan_in, fan_out), dtype, -bound, bound)
        b = jax.random.uniform(kb, (1, fan_out), dtype, -bound, bound)
        return w, b

    keys = jax.random.split(key, n_layers + 2)
    params = {
        "beginning": linear_init(keys[0], n_input, layer_size + n_output),
        "middle": [linear_init(keys[1 + i], layer_size, layer_size + n_output)
                   for i in range(n_layers)],
        "end": linear_init(keys[-1], layer_size, n_output),
    }
    return params


# Pure-JAX reference for correctness checking.
def eagernet_reference(params, x, n_output, layer_size):
    def leaky(v):
        return jnp.where(v > 0, v, NEG_SLOPE * v)

    all_outputs, all_xs = [], []
    w, b = params["beginning"]
    y = x @ w + b
    all_xs.append(x)
    x = leaky(y[:, :layer_size])
    all_outputs.append(y[:, layer_size:])
    for (w, b) in params["middle"]:
        y = x @ w + b
        all_xs.append(x)
        x = leaky(y[:, :layer_size])
        all_outputs.append(y[:, layer_size:])
    all_xs.append(x)
    w, b = params["end"]
    all_outputs.append(x @ w + b)
    return all_outputs, all_xs


if __name__ == "__main__":
    # Small shapes consistent with the module's forward.
    batch = 2
    n_input = 16
    n_output = 4
    n_layers = 2
    layer_size = 32

    key = jax.random.PRNGKey(0)
    pkey, xkey = jax.random.split(key)
    params = init_eagernet_params(pkey, n_input, n_output, n_layers, layer_size)
    x = jax.random.normal(xkey, (batch, n_input), dtype=jnp.float32)

    all_outputs, all_xs = eagernet_forward(params, x, n_output, layer_size)
    jax.block_until_ready(all_outputs)
    jax.block_until_ready(all_xs)

    ref_outputs, ref_xs = eagernet_reference(params, x, n_output, layer_size)
    for got, want in zip(all_outputs, ref_outputs):
        assert got.shape == want.shape
        assert jnp.allclose(got, want, atol=1e-5, rtol=1e-5)
    for got, want in zip(all_xs, ref_xs):
        assert got.shape == want.shape
        assert jnp.allclose(got, want, atol=1e-5, rtol=1e-5)

    assert len(all_outputs) == n_layers + 2
    assert len(all_xs) == n_layers + 2

    print("KERNEL_OK")
</pallas_src>

<mosaic_0001>
module attributes {stable_mosaic.version = 11 : i64} {
  func.func @_fused_eagernet_kernel(%arg0: i32, %arg1: memref<2x16xf32, #tpu.memory_space<vmem>>, %arg2: memref<16x256xf32, #tpu.memory_space<vmem>>, %arg3: memref<1x256xf32, #tpu.memory_space<vmem>>, %arg4: memref<2x128x256xf32, #tpu.memory_space<vmem>>, %arg5: memref<2x1x256xf32, #tpu.memory_space<vmem>>, %arg6: memref<128x128xf32, #tpu.memory_space<vmem>>, %arg7: memref<1x128xf32, #tpu.memory_space<vmem>>, %arg8: memref<4x2x128xf32, #tpu.memory_space<vmem>>, %arg9: memref<3x2x128xf32, #tpu.memory_space<vmem>>) attributes {dimension_semantics = [#tpu.dimension_semantics<parallel>], iteration_bounds = array<i64: 1>, scalar_prefetch = 0 : i64, scratch_operands = 0 : i64, tpu.core_type = #tpu.core_type<tc>, window_params = [{transform_indices = @transform_0, window_bounds = array<i64: 2, 16>}, {pipeline_mode = #tpu.pipeline_mode<synchronous>, transform_indices = @transform_1, window_bounds = array<i64: 16, 256>}, {pipeline_mode = #tpu.pipeline_mode<synchronous>, transform_indices = @transform_2, window_bounds = array<i64: 1, 256>}, {pipeline_mode = #tpu.pipeline_mode<synchronous>, transform_indices = @transform_3, window_bounds = array<i64: 2, 128, 256>}, {pipeline_mode = #tpu.pipeline_mode<synchronous>, transform_indices = @transform_4, window_bounds = array<i64: 2, 1, 256>}, {pipeline_mode = #tpu.pipeline_mode<synchronous>, transform_indices = @transform_5, window_bounds = array<i64: 128, 128>}, {pipeline_mode = #tpu.pipeline_mode<synchronous>, transform_indices = @transform_6, window_bounds = array<i64: 1, 128>}, {transform_indices = @transform_7, window_bounds = array<i64: 4, 2, 128>}, {transform_indices = @transform_8, window_bounds = array<i64: 3, 2, 128>}]} {
    %c0 = arith.constant 0 : index
    %c0_0 = arith.constant 0 : index
    %0 = vector.load %arg1[%c0, %c0_0] : memref<2x16xf32, #tpu.memory_space<vmem>>, vector<2x16xf32>
    %c0_1 = arith.constant 0 : index
    %c0_2 = arith.constant 0 : index
    %1 = vector.load %arg2[%c0_1, %c0_2] : memref<16x256xf32, #tpu.memory_space<vmem>>, vector<16x256xf32>
    %cst = arith.constant dense<0.000000e+00> : vector<2x256xf32>
    %2 = tpu.matmul %0, %1, %cst {dimension_numbers = #tpu.dot_dimension_numbers<[1], [0], [0], [1], [0, 0, 1, 1], [], []>} : vector<2x16xf32>, vector<16x256xf32>, vector<2x256xf32> -> vector<2x256xf32>
    %c0_3 = arith.constant 0 : index
    %c0_4 = arith.constant 0 : index
    %3 = vector.load %arg3[%c0_3, %c0_4] : memref<1x256xf32, #tpu.memory_space<vmem>>, vector<1x256xf32>
    %4 = vector.broadcast %3 : vector<1x256xf32> to vector<2x256xf32>
    %5 = arith.addf %2, %4 : vector<2x256xf32>
    %6 = vector.extract_strided_slice %5 {offsets = [0, 0], sizes = [2, 128], strides = [1, 1]} : vector<2x256xf32> to vector<2x128xf32>
    %7 = vector.extract_strided_slice %5 {offsets = [0, 128], sizes = [2, 128], strides = [1, 1]} : vector<2x256xf32> to vector<2x128xf32>
    %cst_5 = arith.constant 0.00999999977 : f32
    %8 = vector.broadcast %cst_5 : f32 to vector<2x128xf32>
    %9 = arith.mulf %8, %6 : vector<2x128xf32>
    %10 = arith.maximumf %6, %9 : vector<2x128xf32>
    %c0_6 = arith.constant 0 : index
    %c0_7 = arith.constant 0 : index
    %c0_8 = arith.constant 0 : index
    %11 = vector.load %arg8[%c0_6, %c0_7, %c0_8] : memref<4x2x128xf32, #tpu.memory_space<vmem>>, vector<1x2x128xf32>
    %12 = vector.shape_cast %11 : vector<1x2x128xf32> to vector<2x128xf32>
    %13 = vector.shape_cast %7 : vector<2x128xf32> to vector<1x2x128xf32>
    tpu.vector_store %arg8[%c0_6, %c0_7, %c0_8], %13 {strides = array<i32>} : memref<4x2x128xf32, #tpu.memory_space<vmem>>, vector<1x2x128xf32>,
    %c0_9 = arith.constant 0 : index
    %c0_10 = arith.constant 0 : index
    %c0_11 = arith.constant 0 : index
    %14 = vector.load %arg9[%c0_9, %c0_10, %c0_11] : memref<3x2x128xf32, #tpu.memory_space<vmem>>, vector<1x2x128xf32>
    %15 = vector.shape_cast %14 : vector<1x2x128xf32> to vector<2x128xf32>
    %16 = vector.shape_cast %10 : vector<2x128xf32> to vector<1x2x128xf32>
    tpu.vector_store %arg9[%c0_9, %c0_10, %c0_11], %16 {strides = array<i32>} : memref<3x2x128xf32, #tpu.memory_space<vmem>>, vector<1x2x128xf32>,
    %c0_12 = arith.constant 0 : index
    %c0_13 = arith.constant 0 : index
    %c0_14 = arith.constant 0 : index
    %17 = vector.load %arg4[%c0_12, %c0_13, %c0_14] : memref<2x128x256xf32, #tpu.memory_space<vmem>>, vector<1x128x256xf32>
    %18 = vector.shape_cast %17 : vector<1x128x256xf32> to vector<128x256xf32>
    %cst_15 = arith.constant dense<0.000000e+00> : vector<2x256xf32>
    %19 = tpu.matmul %10, %18, %cst_15 {dimension_numbers = #tpu.dot_dimension_numbers<[1], [0], [0], [1], [0, 0, 1, 1], [], []>} : vector<2x128xf32>, vector<128x256xf32>, vector<2x256xf32> -> vector<2x256xf32>
    %c0_16 = arith.constant 0 : index
    %c0_17 = arith.constant 0 : index
    %c0_18 = arith.constant 0 : index
    %20 = vector.load %arg5[%c0_16, %c0_17, %c0_18] : memref<2x1x256xf32, #tpu.memory_space<vmem>>, vector<1x1x256xf32>
    %21 = vector.shape_cast %20 : vector<1x1x256xf32> to vector<1x256xf32>
    %22 = vector.broadcast %21 : vector<1x256xf32> to vector<2x256xf32>
    %23 = arith.addf %19, %22 : vector<2x256xf32>
    %24 = vector.extract_strided_slice %23 {offsets = [0, 0], sizes = [2, 128], strides = [1, 1]} : vector<2x256xf32> to vector<2x128xf32>
    %25 = vector.extract_strided_slice %23 {offsets = [0, 128], sizes = [2, 128], strides = [1, 1]} : vector<2x256xf32> to vector<2x128xf32>
    %cst_19 = arith.constant 0.00999999977 : f32
    %26 = vector.broadcast %cst_19 : f32 to vector<2x128xf32>
    %27 = arith.mulf %26, %24 : vector<2x128xf32>
    %28 = arith.maximumf %24, %27 : vector<2x128xf32>
    %c1 = arith.constant 1 : index
    %c0_20 = arith.constant 0 : index
    %c0_21 = arith.constant 0 : index
    %29 = vector.load %arg8[%c1, %c0_20, %c0_21] : memref<4x2x128xf32, #tpu.memory_space<vmem>>, vector<1x2x128xf32>
    %30 = vector.shape_cast %29 : vector<1x2x128xf32> to vector<2x128xf32>
    %31 = vector.shape_cast %25 : vector<2x128xf32> to vector<1x2x128xf32>
    tpu.vector_store %arg8[%c1, %c0_20, %c0_21], %31 {strides = array<i32>} : memref<4x2x128xf32, #tpu.memory_space<vmem>>, vector<1x2x128xf32>,
    %c1_22 = arith.constant 1 : index
    %c0_23 = arith.constant 0 : index
    %c0_24 = arith.constant 0 : index
    %32 = vector.load %arg9[%c1_22, %c0_23, %c0_24] : memref<3x2x128xf32, #tpu.memory_space<vmem>>, vector<1x2x128xf32>
    %33 = vector.shape_cast %32 : vector<1x2x128xf32> to vector<2x128xf32>
    %34 = vector.shape_cast %28 : vector<2x128xf32> to vector<1x2x128xf32>
    tpu.vector_store %arg9[%c1_22, %c0_23, %c0_24], %34 {strides = array<i32>} : memref<3x2x128xf32, #tpu.memory_space<vmem>>, vector<1x2x128xf32>,
    %c1_25 = arith.constant 1 : index
    %c0_26 = arith.constant 0 : index
    %c0_27 = arith.constant 0 : index
    %35 = vector.load %arg4[%c1_25, %c0_26, %c0_27] : memref<2x128x256xf32, #tpu.memory_space<vmem>>, vector<1x128x256xf32>
    %36 = vector.shape_cast %35 : vector<1x128x256xf32> to vector<128x256xf32>
    %cst_28 = arith.constant dense<0.000000e+00> : vector<2x256xf32>
    %37 = tpu.matmul %28, %36, %cst_28 {dimension_numbers = #tpu.dot_dimension_numbers<[1], [0], [0], [1], [0, 0, 1, 1], [], []>} : vector<2x128xf32>, vector<128x256xf32>, vector<2x256xf32> -> vector<2x256xf32>
    %c1_29 = arith.constant 1 : index
    %c0_30 = arith.constant 0 : index
    %c0_31 = arith.constant 0 : index
    %38 = vector.load %arg5[%c1_29, %c0_30, %c0_31] : memref<2x1x256xf32, #tpu.memory_space<vmem>>, vector<1x1x256xf32>
    %39 = vector.shape_cast %38 : vector<1x1x256xf32> to vector<1x256xf32>
    %40 = vector.broadcast %39 : vector<1x256xf32> to vector<2x256xf32>
    %41 = arith.addf %37, %40 : vector<2x256xf32>
    %42 = vector.extract_strided_slice %41 {offsets = [0, 0], sizes = [2, 128], strides = [1, 1]} : vector<2x256xf32> to vector<2x128xf32>
    %43 = vector.extract_strided_slice %41 {offsets = [0, 128], sizes = [2, 128], strides = [1, 1]} : vector<2x256xf32> to vector<2x128xf32>
    %cst_32 = arith.constant 0.00999999977 : f32
    %44 = vector.broadcast %cst_32 : f32 to vector<2x128xf32>
    %45 = arith.mulf %44, %42 : vector<2x128xf32>
    %46 = arith.maximumf %42, %45 : vector<2x128xf32>
    %c2 = arith.constant 2 : index
    %c0_33 = arith.constant 0 : index
    %c0_34 = arith.constant 0 : index
    %47 = vector.load %arg8[%c2, %c0_33, %c0_34] : memref<4x2x128xf32, #tpu.memory_space<vmem>>, vector<1x2x128xf32>
    %48 = vector.shape_cast %47 : vector<1x2x128xf32> to vector<2x128xf32>
    %49 = vector.shape_cast %43 : vector<2x128xf32> to vector<1x2x128xf32>
    tpu.vector_store %arg8[%c2, %c0_33, %c0_34], %49 {strides = array<i32>} : memref<4x2x128xf32, #tpu.memory_space<vmem>>, vector<1x2x128xf32>,
    %c2_35 = arith.constant 2 : index
    %c0_36 = arith.constant 0 : index
    %c0_37 = arith.constant 0 : index
    %50 = vector.load %arg9[%c2_35, %c0_36, %c0_37] : memref<3x2x128xf32, #tpu.memory_space<vmem>>, vector<1x2x128xf32>
    %51 = vector.shape_cast %50 : vector<1x2x128xf32> to vector<2x128xf32>
    %52 = vector.shape_cast %46 : vector<2x128xf32> to vector<1x2x128xf32>
    tpu.vector_store %arg9[%c2_35, %c0_36, %c0_37], %52 {strides = array<i32>} : memref<3x2x128xf32, #tpu.memory_space<vmem>>, vector<1x2x128xf32>,
    %c0_38 = arith.constant 0 : index
    %c0_39 = arith.constant 0 : index
    %53 = vector.load %arg6[%c0_38, %c0_39] : memref<128x128xf32, #tpu.memory_space<vmem>>, vector<128x128xf32>
    %cst_40 = arith.constant dense<0.000000e+00> : vector<2x128xf32>
    %54 = tpu.matmul %46, %53, %cst_40 {dimension_numbers = #tpu.dot_dimension_numbers<[1], [0], [0], [1], [0, 0, 1, 1], [], []>} : vector<2x128xf32>, vector<128x128xf32>, vector<2x128xf32> -> vector<2x128xf32>
    %c0_41 = arith.constant 0 : index
    %c0_42 = arith.constant 0 : index
    %55 = vector.load %arg7[%c0_41, %c0_42] : memref<1x128xf32, #tpu.memory_space<vmem>>, vector<1x128xf32>
    %56 = vector.broadcast %55 : vector<1x128xf32> to vector<2x128xf32>
    %57 = arith.addf %54, %56 : vector<2x128xf32>
    %c3 = arith.constant 3 : index
    %c0_43 = arith.constant 0 : index
    %c0_44 = arith.constant 0 : index
    %58 = vector.load %arg8[%c3, %c0_43, %c0_44] : memref<4x2x128xf32, #tpu.memory_space<vmem>>, vector<1x2x128xf32>
    %59 = vector.shape_cast %58 : vector<1x2x128xf32> to vector<2x128xf32>
    %60 = vector.shape_cast %57 : vector<2x128xf32> to vector<1x2x128xf32>
    tpu.vector_store %arg8[%c3, %c0_43, %c0_44], %60 {strides = array<i32>} : memref<4x2x128xf32, #tpu.memory_space<vmem>>, vector<1x2x128xf32>,
    return
  }
  func.func @transform_0(%arg0: i32) -> (i32, i32) {
    %c0_i32 = arith.constant 0 : i32
    %c0_i32_0 = arith.constant 0 : i32
    return %arg0, %c0_i32 : i32, i32
  }
  func.func @transform_1(%arg0: i32) -> (i32, i32) {
    %c0_i32 = arith.constant 0 : i32
    %c0_i32_0 = arith.constant 0 : i32
    %c0_i32_1 = arith.constant 0 : i32
    return %c0_i32, %c0_i32_0 : i32, i32
  }
  func.func @transform_2(%arg0: i32) -> (i32, i32) {
    %c0_i32 = arith.constant 0 : i32
    %c0_i32_0 = arith.constant 0 : i32
    %c0_i32_1 = arith.constant 0 : i32
    return %c0_i32, %c0_i32_0 : i32, i32
  }
  func.func @transform_3(%arg0: i32) -> (i32, i32, i32) {
    %c0_i32 = arith.constant 0 : i32
    %c0_i32_0 = arith.constant 0 : i32
    %c0_i32_1 = arith.constant 0 : i32
    %c0_i32_2 = arith.constant 0 : i32
    return %c0_i32, %c0_i32_0, %c0_i32_1 : i32, i32, i32
  }
  func.func @transform_4(%arg0: i32) -> (i32, i32, i32) {
    %c0_i32 = arith.constant 0 : i32
    %c0_i32_0 = arith.constant 0 : i32
    %c0_i32_1 = arith.constant 0 : i32
    %c0_i32_2 = arith.constant 0 : i32
    return %c0_i32, %c0_i32_0, %c0_i32_1 : i32, i32, i32
  }
  func.func @transform_5(%arg0: i32) -> (i32, i32) {
    %c0_i32 = arith.constant 0 : i32
    %c0_i32_0 = arith.constant 0 : i32
    %c0_i32_1 = arith.constant 0 : i32
    return %c0_i32, %c0_i32_0 : i32, i32
  }
  func.func @transform_6(%arg0: i32) -> (i32, i32) {
    %c0_i32 = arith.constant 0 : i32
    %c0_i32_0 = arith.constant 0 : i32
    %c0_i32_1 = arith.constant 0 : i32
    return %c0_i32, %c0_i32_0 : i32, i32
  }
  func.func @transform_7(%arg0: i32) -> (i32, i32, i32) {
    %c0_i32 = arith.constant 0 : i32
    %c0_i32_0 = arith.constant 0 : i32
    %c0_i32_1 = arith.constant 0 : i32
    return %c0_i32, %arg0, %c0_i32_0 : i32, i32, i32
  }
  func.func @transform_8(%arg0: i32) -> (i32, i32, i32) {
    %c0_i32 = arith.constant 0 : i32
    %c0_i32_0 = arith.constant 0 : i32
    %c0_i32_1 = arith.constant 0 : i32
    return %c0_i32, %arg0, %c0_i32_0 : i32, i32, i32
  }
}

module attributes {stable_mosaic.version = 11 : i64} {
  func.func @_fused_eagernet_kernel(%arg0: i32, %arg1: memref<2x16xf32, #tpu.memory_space<vmem>>, %arg2: memref<16x256xf32, #tpu.memory_space<vmem>>, %arg3: memref<1x256xf32, #tpu.memory_space<vmem>>, %arg4: memref<2x128x256xf32, #tpu.memory_space<vmem>>, %arg5: memref<2x1x256xf32, #tpu.memory_space<vmem>>, %arg6: memref<128x128xf32, #tpu.memory_space<vmem>>, %arg7: memref<1x128xf32, #tpu.memory_space<vmem>>, %arg8: memref<4x2x128xf32, #tpu.memory_space<vmem>>, %arg9: memref<3x2x128xf32, #tpu.memory_space<vmem>>) attributes {dimension_semantics = [#tpu.dimension_semantics<parallel>], iteration_bounds = array<i64: 1>, scalar_prefetch = 0 : i64, scratch_operands = 0 : i64, tpu.core_type = #tpu.core_type<tc>, window_params = [{transform_indices = @transform_0, window_bounds = array<i64: 2, 16>}, {pipeline_mode = #tpu.pipeline_mode<synchronous>, transform_indices = @transform_1, window_bounds = array<i64: 16, 256>}, {pipeline_mode = #tpu.pipeline_mode<synchronous>, transform_indices = @transform_2, window_bounds = array<i64: 1, 256>}, {pipeline_mode = #tpu.pipeline_mode<synchronous>, transform_indices = @transform_3, window_bounds = array<i64: 2, 128, 256>}, {pipeline_mode = #tpu.pipeline_mode<synchronous>, transform_indices = @transform_4, window_bounds = array<i64: 2, 1, 256>}, {pipeline_mode = #tpu.pipeline_mode<synchronous>, transform_indices = @transform_5, window_bounds = array<i64: 128, 128>}, {pipeline_mode = #tpu.pipeline_mode<synchronous>, transform_indices = @transform_6, window_bounds = array<i64: 1, 128>}, {transform_indices = @transform_7, window_bounds = array<i64: 4, 2, 128>}, {transform_indices = @transform_8, window_bounds = array<i64: 3, 2, 128>}]} {
    %c0 = arith.constant 0 : index
    %c0_0 = arith.constant 0 : index
    %0 = vector.load %arg1[%c0, %c0_0] : memref<2x16xf32, #tpu.memory_space<vmem>>, vector<2x16xf32>
    %c0_1 = arith.constant 0 : index
    %c0_2 = arith.constant 0 : index
    %1 = vector.load %arg2[%c0_1, %c0_2] : memref<16x256xf32, #tpu.memory_space<vmem>>, vector<16x256xf32>
    %cst = arith.constant dense<0.000000e+00> : vector<2x256xf32>
    %2 = tpu.matmul %0, %1, %cst {dimension_numbers = #tpu.dot_dimension_numbers<[1], [0], [0], [1], [0, 0, 1, 1], [], []>} : vector<2x16xf32>, vector<16x256xf32>, vector<2x256xf32> -> vector<2x256xf32>
    %c0_3 = arith.constant 0 : index
    %c0_4 = arith.constant 0 : index
    %3 = vector.load %arg3[%c0_3, %c0_4] : memref<1x256xf32, #tpu.memory_space<vmem>>, vector<1x256xf32>
    %4 = vector.broadcast %3 : vector<1x256xf32> to vector<2x256xf32>
    %5 = arith.addf %2, %4 : vector<2x256xf32>
    %6 = vector.extract_strided_slice %5 {offsets = [0, 0], sizes = [2, 128], strides = [1, 1]} : vector<2x256xf32> to vector<2x128xf32>
    %7 = vector.extract_strided_slice %5 {offsets = [0, 128], sizes = [2, 128], strides = [1, 1]} : vector<2x256xf32> to vector<2x128xf32>
    %cst_5 = arith.constant 0.00999999977 : f32
    %8 = vector.broadcast %cst_5 : f32 to vector<2x128xf32>
    %9 = arith.mulf %8, %6 : vector<2x128xf32>
    %10 = arith.maximumf %6, %9 : vector<2x128xf32>
    %c0_6 = arith.constant 0 : index
    %c0_7 = arith.constant 0 : index
    %c0_8 = arith.constant 0 : index
    %11 = vector.load %arg8[%c0_6, %c0_7, %c0_8] : memref<4x2x128xf32, #tpu.memory_space<vmem>>, vector<1x2x128xf32>
    %12 = vector.shape_cast %11 : vector<1x2x128xf32> to vector<2x128xf32>
    %13 = vector.shape_cast %7 : vector<2x128xf32> to vector<1x2x128xf32>
    tpu.vector_store %arg8[%c0_6, %c0_7, %c0_8], %13 {strides = array<i32>} : memref<4x2x128xf32, #tpu.memory_space<vmem>>, vector<1x2x128xf32>,
    %c0_9 = arith.constant 0 : index
    %c0_10 = arith.constant 0 : index
    %c0_11 = arith.constant 0 : index
    %14 = vector.load %arg9[%c0_9, %c0_10, %c0_11] : memref<3x2x128xf32, #tpu.memory_space<vmem>>, vector<1x2x128xf32>
    %15 = vector.shape_cast %14 : vector<1x2x128xf32> to vector<2x128xf32>
    %16 = vector.shape_cast %10 : vector<2x128xf32> to vector<1x2x128xf32>
    tpu.vector_store %arg9[%c0_9, %c0_10, %c0_11], %16 {strides = array<i32>} : memref<3x2x128xf32, #tpu.memory_space<vmem>>, vector<1x2x128xf32>,
    %c0_12 = arith.constant 0 : index
    %c0_13 = arith.constant 0 : index
    %c0_14 = arith.constant 0 : index
    %17 = vector.load %arg4[%c0_12, %c0_13, %c0_14] : memref<2x128x256xf32, #tpu.memory_space<vmem>>, vector<1x128x256xf32>
    %18 = vector.shape_cast %17 : vector<1x128x256xf32> to vector<128x256xf32>
    %cst_15 = arith.constant dense<0.000000e+00> : vector<2x256xf32>
    %19 = tpu.matmul %10, %18, %cst_15 {dimension_numbers = #tpu.dot_dimension_numbers<[1], [0], [0], [1], [0, 0, 1, 1], [], []>} : vector<2x128xf32>, vector<128x256xf32>, vector<2x256xf32> -> vector<2x256xf32>
    %c0_16 = arith.constant 0 : index
    %c0_17 = arith.constant 0 : index
    %c0_18 = arith.constant 0 : index
    %20 = vector.load %arg5[%c0_16, %c0_17, %c0_18] : memref<2x1x256xf32, #tpu.memory_space<vmem>>, vector<1x1x256xf32>
    %21 = vector.shape_cast %20 : vector<1x1x256xf32> to vector<1x256xf32>
    %22 = vector.broadcast %21 : vector<1x256xf32> to vector<2x256xf32>
    %23 = arith.addf %19, %22 : vector<2x256xf32>
    %24 = vector.extract_strided_slice %23 {offsets = [0, 0], sizes = [2, 128], strides = [1, 1]} : vector<2x256xf32> to vector<2x128xf32>
    %25 = vector.extract_strided_slice %23 {offsets = [0, 128], sizes = [2, 128], strides = [1, 1]} : vector<2x256xf32> to vector<2x128xf32>
    %cst_19 = arith.constant 0.00999999977 : f32
    %26 = vector.broadcast %cst_19 : f32 to vector<2x128xf32>
    %27 = arith.mulf %26, %24 : vector<2x128xf32>
    %28 = arith.maximumf %24, %27 : vector<2x128xf32>
    %c1 = arith.constant 1 : index
    %c0_20 = arith.constant 0 : index
    %c0_21 = arith.constant 0 : index
    %29 = vector.load %arg8[%c1, %c0_20, %c0_21] : memref<4x2x128xf32, #tpu.memory_space<vmem>>, vector<1x2x128xf32>
    %30 = vector.shape_cast %29 : vector<1x2x128xf32> to vector<2x128xf32>
    %31 = vector.shape_cast %25 : vector<2x128xf32> to vector<1x2x128xf32>
    tpu.vector_store %arg8[%c1, %c0_20, %c0_21], %31 {strides = array<i32>} : memref<4x2x128xf32, #tpu.memory_space<vmem>>, vector<1x2x128xf32>,
    %c1_22 = arith.constant 1 : index
    %c0_23 = arith.constant 0 : index
    %c0_24 = arith.constant 0 : index
    %32 = vector.load %arg9[%c1_22, %c0_23, %c0_24] : memref<3x2x128xf32, #tpu.memory_space<vmem>>, vector<1x2x128xf32>
    %33 = vector.shape_cast %32 : vector<1x2x128xf32> to vector<2x128xf32>
    %34 = vector.shape_cast %28 : vector<2x128xf32> to vector<1x2x128xf32>
    tpu.vector_store %arg9[%c1_22, %c0_23, %c0_24], %34 {strides = array<i32>} : memref<3x2x128xf32, #tpu.memory_space<vmem>>, vector<1x2x128xf32>,
    %c1_25 = arith.constant 1 : index
    %c0_26 = arith.constant 0 : index
    %c0_27 = arith.constant 0 : index
    %35 = vector.load %arg4[%c1_25, %c0_26, %c0_27] : memref<2x128x256xf32, #tpu.memory_space<vmem>>, vector<1x128x256xf32>
    %36 = vector.shape_cast %35 : vector<1x128x256xf32> to vector<128x256xf32>
    %cst_28 = arith.constant dense<0.000000e+00> : vector<2x256xf32>
    %37 = tpu.matmul %28, %36, %cst_28 {dimension_numbers = #tpu.dot_dimension_numbers<[1], [0], [0], [1], [0, 0, 1, 1], [], []>} : vector<2x128xf32>, vector<128x256xf32>, vector<2x256xf32> -> vector<2x256xf32>
    %c1_29 = arith.constant 1 : index
    %c0_30 = arith.constant 0 : index
    %c0_31 = arith.constant 0 : index
    %38 = vector.load %arg5[%c1_29, %c0_30, %c0_31] : memref<2x1x256xf32, #tpu.memory_space<vmem>>, vector<1x1x256xf32>
    %39 = vector.shape_cast %38 : vector<1x1x256xf32> to vector<1x256xf32>
    %40 = vector.broadcast %39 : vector<1x256xf32> to vector<2x256xf32>
    %41 = arith.addf %37, %40 : vector<2x256xf32>
    %42 = vector.extract_strided_slice %41 {offsets = [0, 0], sizes = [2, 128], strides = [1, 1]} : vector<2x256xf32> to vector<2x128xf32>
    %43 = vector.extract_strided_slice %41 {offsets = [0, 128], sizes = [2, 128], strides = [1, 1]} : vector<2x256xf32> to vector<2x128xf32>
    %cst_32 = arith.constant 0.00999999977 : f32
    %44 = vector.broadcast %cst_32 : f32 to vector<2x128xf32>
    %45 = arith.mulf %44, %42 : vector<2x128xf32>
    %46 = arith.maximumf %42, %45 : vector<2x128xf32>
    %c2 = arith.constant 2 : index
    %c0_33 = arith.constant 0 : index
    %c0_34 = arith.constant 0 : index
    %47 = vector.load %arg8[%c2, %c0_33, %c0_34] : memref<4x2x128xf32, #tpu.memory_space<vmem>>, vector<1x2x128xf32>
    %48 = vector.shape_cast %47 : vector<1x2x128xf32> to vector<2x128xf32>
    %49 = vector.shape_cast %43 : vector<2x128xf32> to vector<1x2x128xf32>
    tpu.vector_store %arg8[%c2, %c0_33, %c0_34], %49 {strides = array<i32>} : memref<4x2x128xf32, #tpu.memory_space<vmem>>, vector<1x2x128xf32>,
    %c2_35 = arith.constant 2 : index
    %c0_36 = arith.constant 0 : index
    %c0_37 = arith.constant 0 : index
    %50 = vector.load %arg9[%c2_35, %c0_36, %c0_37] : memref<3x2x128xf32, #tpu.memory_space<vmem>>, vector<1x2x128xf32>
    %51 = vector.shape_cast %50 : vector<1x2x128xf32> to vector<2x128xf32>
    %52 = vector.shape_cast %46 : vector<2x128xf32> to vector<1x2x128xf32>
    tpu.vector_store %arg9[%c2_35, %c0_36, %c0_37], %52 {strides = array<i32>} : memref<3x2x128xf32, #tpu.memory_space<vmem>>, vector<1x2x128xf32>,
    %c0_38 = arith.constant 0 : index
    %c0_39 = arith.constant 0 : index
    %53 = vector.load %arg6[%c0_38, %c0_39] : memref<128x128xf32, #tpu.memory_space<vmem>>, vector<128x128xf32>
    %cst_40 = arith.constant dense<0.000000e+00> : vector<2x128xf32>
    %54 = tpu.matmul %46, %53, %cst_40 {dimension_numbers = #tpu.dot_dimension_numbers<[1], [0], [0], [1], [0, 0, 1, 1], [], []>} : vector<2x128xf32>, vector<128x128xf32>, vector<2x128xf32> -> vector<2x128xf32>
    %c0_41 = arith.constant 0 : index
    %c0_42 = arith.constant 0 : index
    %55 = vector.load %arg7[%c0_41, %c0_42] : memref<1x128xf32, #tpu.memory_space<vmem>>, vector<1x128xf32>
    %56 = vector.broadcast %55 : vector<1x128xf32> to vector<2x128xf32>
    %57 = arith.addf %54, %56 : vector<2x128xf32>
    %c3 = arith.constant 3 : index
    %c0_43 = arith.constant 0 : index
    %c0_44 = arith.constant 0 : index
    %58 = vector.load %arg8[%c3, %c0_43, %c0_44] : memref<4x2x128xf32, #tpu.memory_space<vmem>>, vector<1x2x128xf32>
    %59 = vector.shape_cast %58 : vector<1x2x128xf32> to vector<2x128xf32>
    %60 = vector.shape_cast %57 : vector<2x128xf32> to vector<1x2x128xf32>
    tpu.vector_store %arg8[%c3, %c0_43, %c0_44], %60 {strides = array<i32>} : memref<4x2x128xf32, #tpu.memory_space<vmem>>, vector<1x2x128xf32>,
    return
  }
  func.func @transform_0(%arg0: i32) -> (i32, i32) {
    %c0_i32 = arith.constant 0 : i32
    %c0_i32_0 = arith.constant 0 : i32
    return %arg0, %c0_i32 : i32, i32
  }
  func.func @transform_1(%arg0: i32) -> (i32, i32) {
    %c0_i32 = arith.constant 0 : i32
    %c0_i32_0 = arith.constant 0 : i32
    %c0_i32_1 = arith.constant 0 : i32
    return %c0_i32, %c0_i32_0 : i32, i32
  }
  func.func @transform_2(%arg0: i32) -> (i32, i32) {
    %c0_i32 = arith.constant 0 : i32
    %c0_i32_0 = arith.constant 0 : i32
    %c0_i32_1 = arith.constant 0 : i32
    return %c0_i32, %c0_i32_0 : i32, i32
  }
  func.func @transform_3(%arg0: i32) -> (i32, i32, i32) {
    %c0_i32 = arith.constant 0 : i32
    %c0_i32_0 = arith.constant 0 : i32
    %c0_i32_1 = arith.constant 0 : i32
    %c0_i32_2 = arith.constant 0 : i32
    return %c0_i32, %c0_i32_0, %c0_i32_1 : i32, i32, i32
  }
  func.func @transform_4(%arg0: i32) -> (i32, i32, i32) {
    %c0_i32 = arith.constant 0 : i32
    %c0_i32_0 = arith.constant 0 : i32
    %c0_i32_1 = arith.constant 0 : i32
    %c0_i32_2 = arith.constant 0 : i32
    return %c0_i32, %c0_i32_0, %c0_i32_1 : i32, i32, i32
  }
  func.func @transform_5(%arg0: i32) -> (i32, i32) {
    %c0_i32 = arith.constant 0 : i32
    %c0_i32_0 = arith.constant 0 : i32
    %c0_i32_1 = arith.constant 0 : i32
    return %c0_i32, %c0_i32_0 : i32, i32
  }
  func.func @transform_6(%arg0: i32) -> (i32, i32) {
    %c0_i32 = arith.constant 0 : i32
    %c0_i32_0 = arith.constant 0 : i32
    %c0_i32_1 = arith.constant 0 : i32
    return %c0_i32, %c0_i32_0 : i32, i32
  }
  func.func @transform_7(%arg0: i32) -> (i32, i32, i32) {
    %c0_i32 = arith.constant 0 : i32
    %c0_i32_0 = arith.constant 0 : i32
    %c0_i32_1 = arith.constant 0 : i32
    return %c0_i32, %arg0, %c0_i32_0 : i32, i32, i32
  }
  func.func @transform_8(%arg0: i32) -> (i32, i32, i32) {
    %c0_i32 = arith.constant 0 : i32
    %c0_i32_0 = arith.constant 0 : i32
    %c0_i32_1 = arith.constant 0 : i32
    return %c0_i32, %arg0, %c0_i32_0 : i32, i32, i32
  }
}

</mosaic_0001>

<bundles_post_ra>
// kernel: tpu_custom_call.1
= control target key start
LH: loop header
LB: loop body
LE: loop exit
PB: predicated region body
PF: predicated region fallthrough
CT: control target
= control target key end

     0   :  { %14 = vsyncpa [#allocation3], 0  ;;  %s753_s0 = inlined_call_operand.hbm [shape: f32[2,16], index: 0, kind: input, shape index: {}]   ;;  %s754_s1 = inlined_call_operand.hbm [shape: f32[16,256], index: 1, kind: input, shape index: {}]   ;;  %s755_s2 = inlined_call_operand.hbm [shape: f32[1,256], index: 2, kind: input, shape index: {}]   ;;  %s756_s3 = inlined_call_operand.hbm [shape: f32[2,128,256], index: 3, kind: input, shape index: {}]   ;;  %s757_s4 = inlined_call_operand.hbm [shape: f32[2,1,256], index: 4, kind: input, shape index: {}]   ;;  %s758_s5 = inlined_call_operand.hbm [shape: f32[128,128], index: 5, kind: input, shape index: {}]   ;;  %s759_s6 = inlined_call_operand.vmem [shape: f32[1,128], index: 6, kind: input, shape index: {}]   ;;  %s760_s7 = inlined_call_operand.hbm [shape: f32[4,2,128], index: 7, kind: output, shape index: {0}]   ;;  %s761_s8 = inlined_call_operand.hbm [shape: f32[3,2,128], index: 8, kind: output, shape index: {1}]  }
   0x1   :  { %15 = vsyncpa [#allocation6], 0 }
   0x2   :  { %16 = vsyncpa [#allocation9], 0 }
   0x3   :  { %17 = vsyncpa [#allocation12], 0 }
   0x4   :  { %18 = vsyncpa [#allocation4], 0  ;;  %s35_s29 = sshll.u32 %s754_s1, 4  ;;  %s36_s29 = int_to_ptr.hbm [resolvable:$true] %s35_s29 }
   0x5   :  { %19 = vsyncpa [#allocation15], 0  ;;  %s652_s30 = smov [#allocation5]   ;;  %s59_s12 = sshll.u32 %s756_s3, 4  ;;  %s60_s12 = int_to_ptr.hbm [resolvable:$true] %s59_s12 }
   0x6   :  { %s37_s9 = sshll.u32 %s652_s30, 4  ;;  %s653_s13 = smov 256   ;;  %s38_s9 = int_to_ptr.vmem [resolvable:$true] %s37_s9 }
   0x7   :  { %s654_s14 = smov 16   ;;  %s655_s15 = smov [#allocation8]  }
   0x8   :  { %43 = dma.hbm_to_vmem [thread:$0]  %s36_s29, 512, %s38_s9, [#allocation6], %s653_s13, %s653_s13, %s654_s14  }
   0x9   :  { %s61_s16 = sshll.u32 %s655_s15, 4  ;;  %s25_s19 = sshll.u32 %s753_s0, 4  ;;  %s62_s16 = int_to_ptr.vmem [resolvable:$true] %s61_s16  ;;  %s26_s19 = int_to_ptr.hbm [resolvable:$true] %s25_s19 }
   0xa   :  { %67 = dma.hbm_to_vmem [thread:$0]  %s60_s12, 8192, %s62_s16, [#allocation9], %s653_s13, %s653_s13, %s654_s14  }
   0xb   :  { %s49_s21 = sshll.u32 %s755_s2, 4  ;;  %s656_s22 = smov [#allocation2]   ;;  %s50_s21 = int_to_ptr.hbm [resolvable:$true] %s49_s21 }
   0xc   :  { %s27_s23 = sshll.u32 %s656_s22, 4  ;;  %s657_s3 = smov [#allocation7]   ;;  %s28_s23 = int_to_ptr.vmem [resolvable:$true] %s27_s23 }
   0xd   :  { %30 = dma.hbm_to_vmem [thread:$0]  %s26_s19, 32, %s28_s23, [#allocation3]  }
   0xe   :  { %s51_s24 = sshll.u32 %s657_s3, 4  ;;  %s72_s27 = sshll.u32 %s757_s4, 4  ;;  %s52_s24 = int_to_ptr.vmem [resolvable:$true] %s51_s24  ;;  %s73_s27 = int_to_ptr.hbm [resolvable:$true] %s72_s27 }
   0xf   :  { %54 = dma.hbm_to_vmem [thread:$0]  %s50_s21, 32, %s52_s24, [#allocation6]  }
  0x10   :  { %s658_s0 = smov [#allocation10]   ;;  %s85_s2 = sshll.u32 %s758_s5, 4  ;;  %s86_s2 = int_to_ptr.hbm [resolvable:$true] %s85_s2 }
  0x11   :  { %s74_s28 = sshll.u32 %s658_s0, 4  ;;  %s659_s9 = smov 32   ;;  %s75_s28 = int_to_ptr.vmem [resolvable:$true] %s74_s28 }
  0x12   :  { %s660_s10 = smov 2   ;;  %s661_s11 = smov [#allocation11]  }
  0x13   :  { %80 = dma.hbm_to_vmem [thread:$0]  %s73_s27, 64, %s75_s28, [#allocation9], %s659_s9, %s659_s9, %s660_s10  }
  0x14   :  { %s87_s12 = sshll.u32 %s661_s11, 4  ;;  %s662_s4 = smov 128   ;;  %s88_s12 = int_to_ptr.vmem [resolvable:$true] %s87_s12 }
  0x15   :  { %s663_s13 = smov 8  }
  0x16   :  { %93 = dma.hbm_to_vmem [thread:$0]  %s86_s2, 2048, %s88_s12, [#allocation12], %s662_s4, %s662_s4, %s663_s13  }
  0x17   :  { %640 = dma.done.wait [#allocation3], 32  }
  0x18   :  { %641 = vsyncadd [#allocation3], 4294967264 }
  0x19   :  { %642 = dma.done.wait [#allocation6], 544  }
  0x1a   :  { %643 = vsyncadd [#allocation6], 4294966752 }
  0x1b   :  { %644 = dma.done.wait [#allocation9], 8256  }
  0x1c   :  { %645 = vsyncadd [#allocation9], 4294959040 }
  0x1d   :  { %646 = dma.done.wait [#allocation12], 2048  }
  0x1e   :  { %647 = vsyncadd [#allocation12], 4294965248  ;;  %v123_v0 = vld [vmem:[#allocation5 + $0x10] sm:$0xff]  ;;  %v121_v1 = vld [vmem:[#allocation5] sm:$0xff]  ;;  %vm131_vm0 = vcmask 130048   ;;  %s664_s5 = smov [#allocation14]  }
  0x1f   :  { %v732_v2 = vld [vmem:[#allocation2] sm:$0x3]  ;;  %149 = vmatpush.msra.mxu0 %v123_v0  ;;  %v209_v3 = vld [vmem:[#allocation8 + $0xf0] sm:$0xff]  ;;  %v207_v5 = vld [vmem:[#allocation8 + $0xe0] sm:$0xff]  ;;  %s408_s14 = sshll.u32 %s664_s5, 4  ;;  %s410_s17 = sshll.u32 %s761_s8, 4  ;;  %s409_s14 = int_to_ptr.vmem [resolvable:$true] %s408_s14  ;;  %s411_s17 = int_to_ptr.hbm [resolvable:$true] %s410_s17 }
  0x20   :  { %v210_v4 = vld [vmem:[#allocation8 + $0xf8] sm:$0xff]  ;;  %217 = vmatpush.msra.mxu2 %v209_v3  ;;  %v208_v6 = vld [vmem:[#allocation8 + $0xe8] sm:$0xff]  ;;  %v205_v7 = vld [vmem:[#allocation8 + $0xd0] sm:$0xff]  ;;  %s665_s1 = smov [#allocation13]   ;;  %s397_s23 = sshll.u32 %s760_s7, 4  ;;  %s398_s23 = int_to_ptr.hbm [resolvable:$true] %s397_s23 }
  0x21   :  { %237 = vmatpush.msra.mxu3 %v210_v4  ;;  %150 = vmatpush.msra.mxu0 %v121_v1  ;;  %v206_v8 = vld [vmem:[#allocation8 + $0xd8] sm:$0xff]  ;;  %v203_v9 = vld [vmem:[#allocation8 + $0xc0] sm:$0xff]  ;;  %v204_v10 = vld [vmem:[#allocation8 + $0xc8] sm:$0xff]  ;;  %s395_s20 = sshll.u32 %s665_s1, 4  ;;  %s396_s20 = int_to_ptr.vmem [resolvable:$true] %s395_s20 }
  0x22   :  { %431 = vmatmul.msk.f32.vlgmr.msra.gmra.mxu0 %vm131_vm0, %v732_v2  ;;  %218 = vmatpush.msra.mxu2 %v207_v5  ;;  %v201_v11 = vld [vmem:[#allocation8 + $0xb0] sm:$0xff]  ;;  %v202_v12 = vld [vmem:[#allocation8 + $0xb8] sm:$0xff]  ;;  %v199_v13 = vld [vmem:[#allocation8 + $0xa0] sm:$0xff] }
  0x23   :  { %238 = vmatpush.msra.mxu3 %v208_v6  ;;  %v200_v14 = vld [vmem:[#allocation8 + $0xa8] sm:$0xff]  ;;  %v197_v15 = vld [vmem:[#allocation8 + $0x90] sm:$0xff]  ;;  %v198_v16 = vld [vmem:[#allocation8 + $0x98] sm:$0xff] }
  0x24   :  { %219 = vmatpush.msra.mxu2 %v205_v7  ;;  %v195_v17 = vld [vmem:[#allocation8 + $0x80] sm:$0xff]  ;;  %v196_v18 = vld [vmem:[#allocation8 + $0x88] sm:$0xff]  ;;  %v193_v19 = vld [vmem:[#allocation8 + $0x70] sm:$0xff] }
  0x25   :  { %239 = vmatpush.msra.mxu3 %v206_v8  ;;  %v194_v20 = vld [vmem:[#allocation8 + $0x78] sm:$0xff]  ;;  %v191_v21 = vld [vmem:[#allocation8 + $0x60] sm:$0xff]  ;;  %v192_v22 = vld [vmem:[#allocation8 + $0x68] sm:$0xff] }
  0x26   :  { %220 = vmatpush.msra.mxu2 %v203_v9  ;;  %v189_v23 = vld [vmem:[#allocation8 + $0x50] sm:$0xff]  ;;  %v190_v24 = vld [vmem:[#allocation8 + $0x58] sm:$0xff]  ;;  %v187_v25 = vld [vmem:[#allocation8 + $0x40] sm:$0xff] }
  0x27   :  { %240 = vmatpush.msra.mxu3 %v204_v10  ;;  %v188_v26 = vld [vmem:[#allocation8 + $0x48] sm:$0xff]  ;;  %v185_v27 = vld [vmem:[#allocation8 + $0x30] sm:$0xff]  ;;  %v186_v28 = vld [vmem:[#allocation8 + $0x38] sm:$0xff] }
  0x28   :  { %221 = vmatpush.msra.mxu2 %v201_v11  ;;  %v183_v29 = vld [vmem:[#allocation8 + $0x20] sm:$0xff]  ;;  %v184_v30 = vld [vmem:[#allocation8 + $0x28] sm:$0xff]  ;;  %v181_v31 = vld [vmem:[#allocation8 + $0x10] sm:$0xff] }
  0x29   :  { %241 = vmatpush.msra.mxu3 %v202_v12  ;;  %v182_v32 = vld [vmem:[#allocation8 + $0x18] sm:$0xff]  ;;  %v179_v33 = vld [vmem:[#allocation8] sm:$0xff]  ;;  %v180_v34 = vld [vmem:[#allocation8 + $0x8] sm:$0xff] }
  0x2a   :  { %222 = vmatpush.msra.mxu2 %v199_v13  ;;  %v124_v35 = vld [vmem:[#allocation5 + $0x18] sm:$0xff]  ;;  %v122_v36 = vld [vmem:[#allocation5 + $0x8] sm:$0xff]  ;;  %v125_v57 = vld [vmem:[#allocation7] sm:$0x3] }
  0x2b   :  { %242 = vmatpush.msra.mxu3 %v200_v14  ;;  %v294_v37 = vld [vmem:[#allocation8 + $0x1f0] sm:$0xff]  ;;  %169 = vmatpush.msra.mxu1 %v124_v35  ;;  %v295_v38 = vld [vmem:[#allocation8 + $0x1f8] sm:$0xff]  ;;  %v292_v39 = vld [vmem:[#allocation8 + $0x1e0] sm:$0xff]  ;;  %v127_v61 = vperm.slane %v125_v57, 0  ;;  %v128_v13 = vperm.slane %v125_v57, 1 }
  0x2c   :  { %223 = vmatpush.msra.mxu2 %v197_v15  ;;  %303 = vmatpush.msrb.mxu0 %v294_v37  ;;  %v290_v40 = vld [vmem:[#allocation8 + $0x1d0] sm:$0xff]  ;;  %v293_v41 = vld [vmem:[#allocation8 + $0x1e8] sm:$0xff]  ;;  %v288_v42 = vld [vmem:[#allocation8 + $0x1c0] sm:$0xff] }
  0x2d   :  { %243 = vmatpush.msra.mxu3 %v198_v16  ;;  %170 = vmatpush.msra.mxu1 %v122_v36  ;;  %v291_v43 = vld [vmem:[#allocation8 + $0x1d8] sm:$0xff]  ;;  %v286_v44 = vld [vmem:[#allocation8 + $0x1b0] sm:$0xff]  ;;  %v289_v45 = vld [vmem:[#allocation8 + $0x1c8] sm:$0xff] }
  0x2e   :  { %224 = vmatpush.msra.mxu2 %v195_v17  ;;  %304 = vmatpush.msrb.mxu0 %v292_v39  ;;  %v284_v46 = vld [vmem:[#allocation8 + $0x1a0] sm:$0xff]  ;;  %v287_v47 = vld [vmem:[#allocation8 + $0x1b8] sm:$0xff]  ;;  %v282_v48 = vld [vmem:[#allocation8 + $0x190] sm:$0xff] }
  0x2f   :  { %244 = vmatpush.msra.mxu3 %v196_v18  ;;  %323 = vmatpush.msrb.mxu1 %v295_v38  ;;  %v285_v49 = vld [vmem:[#allocation8 + $0x1a8] sm:$0xff]  ;;  %v280_v50 = vld [vmem:[#allocation8 + $0x180] sm:$0xff]  ;;  %v283_v51 = vld [vmem:[#allocation8 + $0x198] sm:$0xff] }
  0x30   :  { %225 = vmatpush.msra.mxu2 %v193_v19  ;;  %305 = vmatpush.msrb.mxu0 %v290_v40  ;;  %v278_v52 = vld [vmem:[#allocation8 + $0x170] sm:$0xff]  ;;  %v281_v53 = vld [vmem:[#allocation8 + $0x188] sm:$0xff]  ;;  %v276_v54 = vld [vmem:[#allocation8 + $0x160] sm:$0xff] }
  0x31   :  { %245 = vmatpush.msra.mxu3 %v194_v20  ;;  %432 = vmatmul.msk.f32.vlgmr.msra.gmra.mxu1 %vm131_vm0, %v732_v2  ;;  %v279_v55 = vld [vmem:[#allocation8 + $0x178] sm:$0xff]  ;;  %v274_v56 = vld [vmem:[#allocation8 + $0x150] sm:$0xff]  ;;  %v277_v58 = vld [vmem:[#allocation8 + $0x168] sm:$0xff] }
  0x32   :  { %226 = vmatpush.msra.mxu2 %v191_v21  ;;  %324 = vmatpush.msrb.mxu1 %v293_v41  ;;  %v272_v59 = vld [vmem:[#allocation8 + $0x140] sm:$0xff]  ;;  %v275_v60 = vld [vmem:[#allocation8 + $0x158] sm:$0xff]  ;;  %v273_v62 = vld [vmem:[#allocation8 + $0x148] sm:$0xff] }
  0x33   :  { %246 = vmatpush.msra.mxu3 %v192_v22  ;;  %306 = vmatpush.msrb.mxu0 %v288_v42  ;;  %v270_v3 = vld [vmem:[#allocation8 + $0x130] sm:$0xff]  ;;  %v271_v4 = vld [vmem:[#allocation8 + $0x138] sm:$0xff]  ;;  %v268_v5 = vld [vmem:[#allocation8 + $0x120] sm:$0xff] }
  0x34   :  { %227 = vmatpush.msra.mxu2 %v189_v23  ;;  %325 = vmatpush.msrb.mxu1 %v291_v43  ;;  %v269_v6 = vld [vmem:[#allocation8 + $0x128] sm:$0xff]  ;;  %v266_v7 = vld [vmem:[#allocation8 + $0x110] sm:$0xff]  ;;  %v267_v8 = vld [vmem:[#allocation8 + $0x118] sm:$0xff] }
  0x35   :  { %247 = vmatpush.msra.mxu3 %v190_v24  ;;  %307 = vmatpush.msrb.mxu0 %v286_v44  ;;  %v264_v9 = vld [vmem:[#allocation8 + $0x100] sm:$0xff]  ;;  %v265_v10 = vld [vmem:[#allocation8 + $0x108] sm:$0xff]  ;;  %v363_v12 = vld [vmem:[#allocation11 + $0x70] sm:$0xff] }
  0x36   :  { %228 = vmatpush.msra.mxu2 %v187_v25  ;;  %326 = vmatpush.msrb.mxu1 %v289_v45  ;;  %v364_v11 = vld [vmem:[#allocation11 + $0x78] sm:$0xff]  ;;  %v362_v15 = vld [vmem:[#allocation11 + $0x68] sm:$0xff]  ;;  %v361_v17 = vld [vmem:[#allocation11 + $0x60] sm:$0xff] }
  0x37   :  { %248 = vmatpush.msra.mxu3 %v188_v26  ;;  %308 = vmatpush.msrb.mxu0 %v284_v46  ;;  %v360_v18 = vld [vmem:[#allocation11 + $0x58] sm:$0xff]  ;;  %v359_v19 = vld [vmem:[#allocation11 + $0x50] sm:$0xff]  ;;  %v358_v20 = vld [vmem:[#allocation11 + $0x48] sm:$0xff] }
  0x38   :  { %229 = vmatpush.msra.mxu2 %v185_v27  ;;  %327 = vmatpush.msrb.mxu1 %v287_v47  ;;  %v357_v21 = vld [vmem:[#allocation11 + $0x40] sm:$0xff]  ;;  %v356_v22 = vld [vmem:[#allocation11 + $0x38] sm:$0xff]  ;;  %v355_v23 = vld [vmem:[#allocation11 + $0x30] sm:$0xff] }
  0x39   :  { %249 = vmatpush.msra.mxu3 %v186_v28  ;;  %309 = vmatpush.msrb.mxu0 %v282_v48  ;;  %v354_v24 = vld [vmem:[#allocation11 + $0x28] sm:$0xff]  ;;  %v211_v25 = vld [vmem:[#allocation10] sm:$0x3]  ;;  %v353_v26 = vld [vmem:[#allocation11 + $0x20] sm:$0xff] }
  0x3a   :  { %230 = vmatpush.msra.mxu2 %v183_v29  ;;  %328 = vmatpush.msrb.mxu1 %v285_v49  ;;  %v213_v27 = vperm.slane %v211_v25, 0  ;;  %v214_v28 = vperm.slane %v211_v25, 1  ;;  %v352_v35 = vld [vmem:[#allocation11 + $0x18] sm:$0xff]  ;;  %v351_v36 = vld [vmem:[#allocation11 + $0x10] sm:$0xff]  ;;  %v350_v37 = vld [vmem:[#allocation11 + $0x8] sm:$0xff] }
  0x3b   :  { %250 = vmatpush.msra.mxu3 %v184_v30  ;;  %310 = vmatpush.msrb.mxu0 %v280_v50  ;;  %v349_v38 = vld [vmem:[#allocation11] sm:$0xff]  ;;  %v297_v39 = vld [vmem:[#allocation10 + $0x2] sm:$0x3]  ;;  %v447_v48 = vld [vmem:[%s759_s6] ss:$0 sm:$0xff] }
  0x3c   :  { %231 = vmatpush.msra.mxu2 %v181_v31  ;;  %329 = vmatpush.msrb.mxu1 %v283_v51  ;;  %v299_v40 = vperm.slane %v297_v39, 0  ;;  %v300_v41 = vperm.slane %v297_v39, 1 }
  0x3d   :  { %251 = vmatpush.msra.mxu3 %v182_v32  ;;  %311 = vmatpush.msrb.mxu0 %v278_v52 }
  0x3e   :  { %232 = vmatpush.msra.mxu2 %v179_v33  ;;  %330 = vmatpush.msrb.mxu1 %v281_v53 }
  0x3f   :  { %252 = vmatpush.msra.mxu3 %v180_v34  ;;  %312 = vmatpush.msrb.mxu0 %v276_v54 }
  0x40   :  { %331 = vmatpush.msrb.mxu1 %v279_v55  ;;  %369 = vmatpush.msrb.mxu2 %v364_v11 }
  0x41   :  { %313 = vmatpush.msrb.mxu0 %v274_v56 }
  0x42   :  { %332 = vmatpush.msrb.mxu1 %v277_v58  ;;  %370 = vmatpush.msrb.mxu2 %v363_v12 }
  0x43   :  { %314 = vmatpush.msrb.mxu0 %v272_v59 }
  0x44   :  { %333 = vmatpush.msrb.mxu1 %v275_v60  ;;  %371 = vmatpush.msrb.mxu2 %v362_v15 }
  0x45   :  { %315 = vmatpush.msrb.mxu0 %v270_v3 }
  0x46   :  { %334 = vmatpush.msrb.mxu1 %v273_v62  ;;  %372 = vmatpush.msrb.mxu2 %v361_v17 }
  0x47   :  { %316 = vmatpush.msrb.mxu0 %v268_v5 }
  0x48   :  { %335 = vmatpush.msrb.mxu1 %v271_v4  ;;  %373 = vmatpush.msrb.mxu2 %v360_v18 }
  0x49   :  { %317 = vmatpush.msrb.mxu0 %v266_v7 }
  0x4a   :  { %336 = vmatpush.msrb.mxu1 %v269_v6  ;;  %374 = vmatpush.msrb.mxu2 %v359_v19 }
  0x4b   :  { %318 = vmatpush.msrb.mxu0 %v264_v9 }
  0x4c   :  { %337 = vmatpush.msrb.mxu1 %v267_v8  ;;  %375 = vmatpush.msrb.mxu2 %v358_v20 }
  0x4e   :  { %338 = vmatpush.msrb.mxu1 %v265_v10  ;;  %376 = vmatpush.msrb.mxu2 %v357_v21 }
  0x50   :  { %377 = vmatpush.msrb.mxu2 %v356_v22 }
  0x52   :  { %378 = vmatpush.msrb.mxu2 %v355_v23 }
  0x54   :  { %379 = vmatpush.msrb.mxu2 %v354_v24 }
  0x56   :  { %380 = vmatpush.msrb.mxu2 %v353_v26 }
  0x58   :  { %381 = vmatpush.msrb.mxu2 %v352_v35 }
  0x5a   :  { %382 = vmatpush.msrb.mxu2 %v351_v36 }
  0x5c   :  { %383 = vmatpush.msrb.mxu2 %v350_v37 }
  0x5e   :  { %384 = vmatpush.msrb.mxu2 %v349_v38 }
  0x9f   :  { %v152_v63 = vpop.f32.mrf.mxu0 }
  0xa0   :  { %v153_v0 = vadd.f32 %v152_v63, %v127_v61 }
  0xa2   :  { %v175_v1 = vmul.f32 0.01, %v153_v0 }
  0xa4   :  { %v176_v2 = vmax.f32 %v153_v0, %v175_v1 }
  0xa6   :  { %178 = vst [vmem:[#allocation14] sm:$0x3] %v176_v2  ;;  %233 = vmatmul.f32.vlgmr.msra.gmra.mxu2 %v176_v2  ;;  %253 = vmatmul.f32.vlgmr.msra.gmra.mxu3 %v176_v2 }
  0xae   :  { %v172_v14 = vpop.f32.mrf.mxu1 }
  0xaf   :  { %v173_v16 = vadd.f32 %v172_v14, %v128_v13 }
  0xb1   :  { %177 = vst [vmem:[#allocation13] sm:$0x3] %v173_v16 }
 0x129   :  { %v234_v29 = vpop.f32.mrf.mxu2  ;;  %v254_v30 = vpop.f32.mrf.mxu3 }
 0x12a   :  { %v235_v31 = vadd.f32 %v234_v29, %v213_v27  ;;  %v255_v32 = vadd.f32 %v254_v30, %v214_v28 }
 0x12c   :  { %v257_v33 = vmul.f32 0.01, %v235_v31  ;;  %260 = vst [vmem:[#allocation13 + $0x2] sm:$0x3] %v255_v32 }
 0x12e   :  { %v258_v34 = vmax.f32 %v235_v31, %v257_v33 }
 0x130   :  { %262 = vst [vmem:[#allocation14 + $0x2] sm:$0x3] %v258_v34  ;;  %319 = vmatmul.f32.vlgmr.msrb.gmra.mxu0 %v258_v34  ;;  %339 = vmatmul.f32.vlgmr.msrb.gmra.mxu1 %v258_v34 }
 0x1ad   :  { %v320_v42 = vpop.f32.mrf.mxu0  ;;  %v340_v43 = vpop.f32.mrf.mxu1 }
 0x1ae   :  { %v321_v44 = vadd.f32 %v320_v42, %v299_v40  ;;  %v341_v45 = vadd.f32 %v340_v43, %v300_v41 }
 0x1b0   :  { %v343_v46 = vmul.f32 0.01, %v321_v44  ;;  %346 = vst [vmem:[#allocation13 + $0x4] sm:$0x3] %v341_v45 }
 0x1b2   :  { %v344_v47 = vmax.f32 %v321_v44, %v343_v46 }
 0x1b4   :  { %348 = vst [vmem:[#allocation14 + $0x4] sm:$0x3] %v344_v47  ;;  %385 = vmatmul.f32.vlgmr.msrb.gmra.mxu2 %v344_v47 }
 0x1b5   :  { %416 = dma.vmem_to_hbm [thread:$0]  %s409_s14, 96, %s411_s17, [#allocation15], %s659_s9, %s659_s9, %s660_s10  }
 0x237   :  { %v386_v49 = vpop.f32.mrf.mxu2 }
 0x238   :  { %v387_v50 = vadd.f32 %v447_v48, %v386_v49 }
 0x23a   :  { %390 = vst [vmem:[#allocation13 + $0x6] sm:$0x3] %v387_v50 }
 0x23b   :  { %403 = dma.vmem_to_hbm [thread:$0]  %s396_s20, 128, %s398_s23, [#allocation4], %s659_s9, %s659_s9, %s660_s10  }
 0x23c   :  { %648 = dma.done.wait [#allocation4], 128  }
 0x23d   :  { %649 = vsyncadd [#allocation4], 4294967168 }
 0x23e   :  { %650 = dma.done.wait [#allocation15], 96  }
 0x23f   :  { %651 = vsyncadd [#allocation15], 4294967200 }
 0x240   :  { %425 = vsyncpa [#allocation3], 1 }
 0x241   :  { %426 = vsyncpa [#allocation6], 1 }
 0x242   :  { %427 = vsyncpa [#allocation9], 1 }
 0x243   :  { %428 = vsyncpa [#allocation12], 1 }
 0x244   :  { %429 = vsyncpa [#allocation4], 1 }
 0x245   :  { %430 = vsyncpa [#allocation15], 1 }

// kernel: tpu_custom_call.1
= control target key start
LH: loop header
LB: loop body
LE: loop exit
PB: predicated region body
PF: predicated region fallthrough
CT: control target
= control target key end

     0   :  { %14 = vsyncpa [#allocation3], 0  ;;  %s753_s0 = inlined_call_operand.hbm [shape: f32[2,16], index: 0, kind: input, shape index: {}]   ;;  %s754_s1 = inlined_call_operand.hbm [shape: f32[16,256], index: 1, kind: input, shape index: {}]   ;;  %s755_s2 = inlined_call_operand.hbm [shape: f32[1,256], index: 2, kind: input, shape index: {}]   ;;  %s756_s3 = inlined_call_operand.hbm [shape: f32[2,128,256], index: 3, kind: input, shape index: {}]   ;;  %s757_s4 = inlined_call_operand.hbm [shape: f32[2,1,256], index: 4, kind: input, shape index: {}]   ;;  %s758_s5 = inlined_call_operand.hbm [shape: f32[128,128], index: 5, kind: input, shape index: {}]   ;;  %s759_s6 = inlined_call_operand.vmem [shape: f32[1,128], index: 6, kind: input, shape index: {}]   ;;  %s760_s7 = inlined_call_operand.hbm [shape: f32[4,2,128], index: 7, kind: output, shape index: {0}]   ;;  %s761_s8 = inlined_call_operand.hbm [shape: f32[3,2,128], index: 8, kind: output, shape index: {1}]  }
   0x1   :  { %15 = vsyncpa [#allocation6], 0 }
   0x2   :  { %16 = vsyncpa [#allocation9], 0 }
   0x3   :  { %17 = vsyncpa [#allocation12], 0 }
   0x4   :  { %18 = vsyncpa [#allocation4], 0  ;;  %s35_s29 = sshll.u32 %s754_s1, 4  ;;  %s36_s29 = int_to_ptr.hbm [resolvable:$true] %s35_s29 }
   0x5   :  { %19 = vsyncpa [#allocation15], 0  ;;  %s652_s30 = smov [#allocation5]   ;;  %s59_s12 = sshll.u32 %s756_s3, 4  ;;  %s60_s12 = int_to_ptr.hbm [resolvable:$true] %s59_s12 }
   0x6   :  { %s37_s9 = sshll.u32 %s652_s30, 4  ;;  %s653_s13 = smov 256   ;;  %s38_s9 = int_to_ptr.vmem [resolvable:$true] %s37_s9 }
   0x7   :  { %s654_s14 = smov 16   ;;  %s655_s15 = smov [#allocation8]  }
   0x8   :  { %43 = dma.hbm_to_vmem [thread:$0]  %s36_s29, 512, %s38_s9, [#allocation6], %s653_s13, %s653_s13, %s654_s14  }
   0x9   :  { %s61_s16 = sshll.u32 %s655_s15, 4  ;;  %s25_s19 = sshll.u32 %s753_s0, 4  ;;  %s62_s16 = int_to_ptr.vmem [resolvable:$true] %s61_s16  ;;  %s26_s19 = int_to_ptr.hbm [resolvable:$true] %s25_s19 }
   0xa   :  { %67 = dma.hbm_to_vmem [thread:$0]  %s60_s12, 8192, %s62_s16, [#allocation9], %s653_s13, %s653_s13, %s654_s14  }
   0xb   :  { %s49_s21 = sshll.u32 %s755_s2, 4  ;;  %s656_s22 = smov [#allocation2]   ;;  %s50_s21 = int_to_ptr.hbm [resolvable:$true] %s49_s21 }
   0xc   :  { %s27_s23 = sshll.u32 %s656_s22, 4  ;;  %s657_s3 = smov [#allocation7]   ;;  %s28_s23 = int_to_ptr.vmem [resolvable:$true] %s27_s23 }
   0xd   :  { %30 = dma.hbm_to_vmem [thread:$0]  %s26_s19, 32, %s28_s23, [#allocation3]  }
   0xe   :  { %s51_s24 = sshll.u32 %s657_s3, 4  ;;  %s72_s27 = sshll.u32 %s757_s4, 4  ;;  %s52_s24 = int_to_ptr.vmem [resolvable:$true] %s51_s24  ;;  %s73_s27 = int_to_ptr.hbm [resolvable:$true] %s72_s27 }
   0xf   :  { %54 = dma.hbm_to_vmem [thread:$0]  %s50_s21, 32, %s52_s24, [#allocation6]  }
  0x10   :  { %s658_s0 = smov [#allocation10]   ;;  %s85_s2 = sshll.u32 %s758_s5, 4  ;;  %s86_s2 = int_to_ptr.hbm [resolvable:$true] %s85_s2 }
  0x11   :  { %s74_s28 = sshll.u32 %s658_s0, 4  ;;  %s659_s9 = smov 32   ;;  %s75_s28 = int_to_ptr.vmem [resolvable:$true] %s74_s28 }
  0x12   :  { %s660_s10 = smov 2   ;;  %s661_s11 = smov [#allocation11]  }
  0x13   :  { %80 = dma.hbm_to_vmem [thread:$0]  %s73_s27, 64, %s75_s28, [#allocation9], %s659_s9, %s659_s9, %s660_s10  }
  0x14   :  { %s87_s12 = sshll.u32 %s661_s11, 4  ;;  %s662_s4 = smov 128   ;;  %s88_s12 = int_to_ptr.vmem [resolvable:$true] %s87_s12 }
  0x15   :  { %s663_s13 = smov 8  }
  0x16   :  { %93 = dma.hbm_to_vmem [thread:$0]  %s86_s2, 2048, %s88_s12, [#allocation12], %s662_s4, %s662_s4, %s663_s13  }
  0x17   :  { %640 = dma.done.wait [#allocation3], 32  }
  0x18   :  { %641 = vsyncadd [#allocation3], 4294967264 }
  0x19   :  { %642 = dma.done.wait [#allocation6], 544  }
  0x1a   :  { %643 = vsyncadd [#allocation6], 4294966752 }
  0x1b   :  { %644 = dma.done.wait [#allocation9], 8256  }
  0x1c   :  { %645 = vsyncadd [#allocation9], 4294959040 }
  0x1d   :  { %646 = dma.done.wait [#allocation12], 2048  }
  0x1e   :  { %647 = vsyncadd [#allocation12], 4294965248  ;;  %v123_v0 = vld [vmem:[#allocation5 + $0x10] sm:$0xff]  ;;  %v121_v1 = vld [vmem:[#allocation5] sm:$0xff]  ;;  %vm131_vm0 = vcmask 130048   ;;  %s664_s5 = smov [#allocation14]  }
  0x1f   :  { %v732_v2 = vld [vmem:[#allocation2] sm:$0x3]  ;;  %149 = vmatpush.msra.mxu0 %v123_v0  ;;  %v209_v3 = vld [vmem:[#allocation8 + $0xf0] sm:$0xff]  ;;  %v207_v5 = vld [vmem:[#allocation8 + $0xe0] sm:$0xff]  ;;  %s408_s14 = sshll.u32 %s664_s5, 4  ;;  %s410_s17 = sshll.u32 %s761_s8, 4  ;;  %s409_s14 = int_to_ptr.vmem [resolvable:$true] %s408_s14  ;;  %s411_s17 = int_to_ptr.hbm [resolvable:$true] %s410_s17 }
  0x20   :  { %v210_v4 = vld [vmem:[#allocation8 + $0xf8] sm:$0xff]  ;;  %217 = vmatpush.msra.mxu2 %v209_v3  ;;  %v208_v6 = vld [vmem:[#allocation8 + $0xe8] sm:$0xff]  ;;  %v205_v7 = vld [vmem:[#allocation8 + $0xd0] sm:$0xff]  ;;  %s665_s1 = smov [#allocation13]   ;;  %s397_s23 = sshll.u32 %s760_s7, 4  ;;  %s398_s23 = int_to_ptr.hbm [resolvable:$true] %s397_s23 }
  0x21   :  { %237 = vmatpush.msra.mxu3 %v210_v4  ;;  %150 = vmatpush.msra.mxu0 %v121_v1  ;;  %v206_v8 = vld [vmem:[#allocation8 + $0xd8] sm:$0xff]  ;;  %v203_v9 = vld [vmem:[#allocation8 + $0xc0] sm:$0xff]  ;;  %v204_v10 = vld [vmem:[#allocation8 + $0xc8] sm:$0xff]  ;;  %s395_s20 = sshll.u32 %s665_s1, 4  ;;  %s396_s20 = int_to_ptr.vmem [resolvable:$true] %s395_s20 }
  0x22   :  { %431 = vmatmul.msk.f32.vlgmr.msra.gmra.mxu0 %vm131_vm0, %v732_v2  ;;  %218 = vmatpush.msra.mxu2 %v207_v5  ;;  %v201_v11 = vld [vmem:[#allocation8 + $0xb0] sm:$0xff]  ;;  %v202_v12 = vld [vmem:[#allocation8 + $0xb8] sm:$0xff]  ;;  %v199_v13 = vld [vmem:[#allocation8 + $0xa0] sm:$0xff] }
  0x23   :  { %238 = vmatpush.msra.mxu3 %v208_v6  ;;  %v200_v14 = vld [vmem:[#allocation8 + $0xa8] sm:$0xff]  ;;  %v197_v15 = vld [vmem:[#allocation8 + $0x90] sm:$0xff]  ;;  %v198_v16 = vld [vmem:[#allocation8 + $0x98] sm:$0xff] }
  0x24   :  { %219 = vmatpush.msra.mxu2 %v205_v7  ;;  %v195_v17 = vld [vmem:[#allocation8 + $0x80] sm:$0xff]  ;;  %v196_v18 = vld [vmem:[#allocation8 + $0x88] sm:$0xff]  ;;  %v193_v19 = vld [vmem:[#allocation8 + $0x70] sm:$0xff] }
  0x25   :  { %239 = vmatpush.msra.mxu3 %v206_v8  ;;  %v194_v20 = vld [vmem:[#allocation8 + $0x78] sm:$0xff]  ;;  %v191_v21 = vld [vmem:[#allocation8 + $0x60] sm:$0xff]  ;;  %v192_v22 = vld [vmem:[#allocation8 + $0x68] sm:$0xff] }
  0x26   :  { %220 = vmatpush.msra.mxu2 %v203_v9  ;;  %v189_v23 = vld [vmem:[#allocation8 + $0x50] sm:$0xff]  ;;  %v190_v24 = vld [vmem:[#allocation8 + $0x58] sm:$0xff]  ;;  %v187_v25 = vld [vmem:[#allocation8 + $0x40] sm:$0xff] }
  0x27   :  { %240 = vmatpush.msra.mxu3 %v204_v10  ;;  %v188_v26 = vld [vmem:[#allocation8 + $0x48] sm:$0xff]  ;;  %v185_v27 = vld [vmem:[#allocation8 + $0x30] sm:$0xff]  ;;  %v186_v28 = vld [vmem:[#allocation8 + $0x38] sm:$0xff] }
  0x28   :  { %221 = vmatpush.msra.mxu2 %v201_v11  ;;  %v183_v29 = vld [vmem:[#allocation8 + $0x20] sm:$0xff]  ;;  %v184_v30 = vld [vmem:[#allocation8 + $0x28] sm:$0xff]  ;;  %v181_v31 = vld [vmem:[#allocation8 + $0x10] sm:$0xff] }
  0x29   :  { %241 = vmatpush.msra.mxu3 %v202_v12  ;;  %v182_v32 = vld [vmem:[#allocation8 + $0x18] sm:$0xff]  ;;  %v179_v33 = vld [vmem:[#allocation8] sm:$0xff]  ;;  %v180_v34 = vld [vmem:[#allocation8 + $0x8] sm:$0xff] }
  0x2a   :  { %222 = vmatpush.msra.mxu2 %v199_v13  ;;  %v124_v35 = vld [vmem:[#allocation5 + $0x18] sm:$0xff]  ;;  %v122_v36 = vld [vmem:[#allocation5 + $0x8] sm:$0xff]  ;;  %v125_v57 = vld [vmem:[#allocation7] sm:$0x3] }
  0x2b   :  { %242 = vmatpush.msra.mxu3 %v200_v14  ;;  %v294_v37 = vld [vmem:[#allocation8 + $0x1f0] sm:$0xff]  ;;  %169 = vmatpush.msra.mxu1 %v124_v35  ;;  %v295_v38 = vld [vmem:[#allocation8 + $0x1f8] sm:$0xff]  ;;  %v292_v39 = vld [vmem:[#allocation8 + $0x1e0] sm:$0xff]  ;;  %v127_v61 = vperm.slane %v125_v57, 0  ;;  %v128_v13 = vperm.slane %v125_v57, 1 }
  0x2c   :  { %223 = vmatpush.msra.mxu2 %v197_v15  ;;  %303 = vmatpush.msrb.mxu0 %v294_v37  ;;  %v290_v40 = vld [vmem:[#allocation8 + $0x1d0] sm:$0xff]  ;;  %v293_v41 = vld [vmem:[#allocation8 + $0x1e8] sm:$0xff]  ;;  %v288_v42 = vld [vmem:[#allocation8 + $0x1c0] sm:$0xff] }
  0x2d   :  { %243 = vmatpush.msra.mxu3 %v198_v16  ;;  %170 = vmatpush.msra.mxu1 %v122_v36  ;;  %v291_v43 = vld [vmem:[#allocation8 + $0x1d8] sm:$0xff]  ;;  %v286_v44 = vld [vmem:[#allocation8 + $0x1b0] sm:$0xff]  ;;  %v289_v45 = vld [vmem:[#allocation8 + $0x1c8] sm:$0xff] }
  0x2e   :  { %224 = vmatpush.msra.mxu2 %v195_v17  ;;  %304 = vmatpush.msrb.mxu0 %v292_v39  ;;  %v284_v46 = vld [vmem:[#allocation8 + $0x1a0] sm:$0xff]  ;;  %v287_v47 = vld [vmem:[#allocation8 + $0x1b8] sm:$0xff]  ;;  %v282_v48 = vld [vmem:[#allocation8 + $0x190] sm:$0xff] }
  0x2f   :  { %244 = vmatpush.msra.mxu3 %v196_v18  ;;  %323 = vmatpush.msrb.mxu1 %v295_v38  ;;  %v285_v49 = vld [vmem:[#allocation8 + $0x1a8] sm:$0xff]  ;;  %v280_v50 = vld [vmem:[#allocation8 + $0x180] sm:$0xff]  ;;  %v283_v51 = vld [vmem:[#allocation8 + $0x198] sm:$0xff] }
  0x30   :  { %225 = vmatpush.msra.mxu2 %v193_v19  ;;  %305 = vmatpush.msrb.mxu0 %v290_v40  ;;  %v278_v52 = vld [vmem:[#allocation8 + $0x170] sm:$0xff]  ;;  %v281_v53 = vld [vmem:[#allocation8 + $0x188] sm:$0xff]  ;;  %v276_v54 = vld [vmem:[#allocation8 + $0x160] sm:$0xff] }
  0x31   :  { %245 = vmatpush.msra.mxu3 %v194_v20  ;;  %432 = vmatmul.msk.f32.vlgmr.msra.gmra.mxu1 %vm131_vm0, %v732_v2  ;;  %v279_v55 = vld [vmem:[#allocation8 + $0x178] sm:$0xff]  ;;  %v274_v56 = vld [vmem:[#allocation8 + $0x150] sm:$0xff]  ;;  %v277_v58 = vld [vmem:[#allocation8 + $0x168] sm:$0xff] }
  0x32   :  { %226 = vmatpush.msra.mxu2 %v191_v21  ;;  %324 = vmatpush.msrb.mxu1 %v293_v41  ;;  %v272_v59 = vld [vmem:[#allocation8 + $0x140] sm:$0xff]  ;;  %v275_v60 = vld [vmem:[#allocation8 + $0x158] sm:$0xff]  ;;  %v273_v62 = vld [vmem:[#allocation8 + $0x148] sm:$0xff] }
  0x33   :  { %246 = vmatpush.msra.mxu3 %v192_v22  ;;  %306 = vmatpush.msrb.mxu0 %v288_v42  ;;  %v270_v3 = vld [vmem:[#allocation8 + $0x130] sm:$0xff]  ;;  %v271_v4 = vld [vmem:[#allocation8 + $0x138] sm:$0xff]  ;;  %v268_v5 = vld [vmem:[#allocation8 + $0x120] sm:$0xff] }
  0x34   :  { %227 = vmatpush.msra.mxu2 %v189_v23  ;;  %325 = vmatpush.msrb.mxu1 %v291_v43  ;;  %v269_v6 = vld [vmem:[#allocation8 + $0x128] sm:$0xff]  ;;  %v266_v7 = vld [vmem:[#allocation8 + $0x110] sm:$0xff]  ;;  %v267_v8 = vld [vmem:[#allocation8 + $0x118] sm:$0xff] }
  0x35   :  { %247 = vmatpush.msra.mxu3 %v190_v24  ;;  %307 = vmatpush.msrb.mxu0 %v286_v44  ;;  %v264_v9 = vld [vmem:[#allocation8 + $0x100] sm:$0xff]  ;;  %v265_v10 = vld [vmem:[#allocation8 + $0x108] sm:$0xff]  ;;  %v363_v12 = vld [vmem:[#allocation11 + $0x70] sm:$0xff] }
  0x36   :  { %228 = vmatpush.msra.mxu2 %v187_v25  ;;  %326 = vmatpush.msrb.mxu1 %v289_v45  ;;  %v364_v11 = vld [vmem:[#allocation11 + $0x78] sm:$0xff]  ;;  %v362_v15 = vld [vmem:[#allocation11 + $0x68] sm:$0xff]  ;;  %v361_v17 = vld [vmem:[#allocation11 + $0x60] sm:$0xff] }
  0x37   :  { %248 = vmatpush.msra.mxu3 %v188_v26  ;;  %308 = vmatpush.msrb.mxu0 %v284_v46  ;;  %v360_v18 = vld [vmem:[#allocation11 + $0x58] sm:$0xff]  ;;  %v359_v19 = vld [vmem:[#allocation11 + $0x50] sm:$0xff]  ;;  %v358_v20 = vld [vmem:[#allocation11 + $0x48] sm:$0xff] }
  0x38   :  { %229 = vmatpush.msra.mxu2 %v185_v27  ;;  %327 = vmatpush.msrb.mxu1 %v287_v47  ;;  %v357_v21 = vld [vmem:[#allocation11 + $0x40] sm:$0xff]  ;;  %v356_v22 = vld [vmem:[#allocation11 + $0x38] sm:$0xff]  ;;  %v355_v23 = vld [vmem:[#allocation11 + $0x30] sm:$0xff] }
  0x39   :  { %249 = vmatpush.msra.mxu3 %v186_v28  ;;  %309 = vmatpush.msrb.mxu0 %v282_v48  ;;  %v354_v24 = vld [vmem:[#allocation11 + $0x28] sm:$0xff]  ;;  %v211_v25 = vld [vmem:[#allocation10] sm:$0x3]  ;;  %v353_v26 = vld [vmem:[#allocation11 + $0x20] sm:$0xff] }
  0x3a   :  { %230 = vmatpush.msra.mxu2 %v183_v29  ;;  %328 = vmatpush.msrb.mxu1 %v285_v49  ;;  %v213_v27 = vperm.slane %v211_v25, 0  ;;  %v214_v28 = vperm.slane %v211_v25, 1  ;;  %v352_v35 = vld [vmem:[#allocation11 + $0x18] sm:$0xff]  ;;  %v351_v36 = vld [vmem:[#allocation11 + $0x10] sm:$0xff]  ;;  %v350_v37 = vld [vmem:[#allocation11 + $0x8] sm:$0xff] }
  0x3b   :  { %250 = vmatpush.msra.mxu3 %v184_v30  ;;  %310 = vmatpush.msrb.mxu0 %v280_v50  ;;  %v349_v38 = vld [vmem:[#allocation11] sm:$0xff]  ;;  %v297_v39 = vld [vmem:[#allocation10 + $0x2] sm:$0x3]  ;;  %v447_v48 = vld [vmem:[%s759_s6] ss:$0 sm:$0xff] }
  0x3c   :  { %231 = vmatpush.msra.mxu2 %v181_v31  ;;  %329 = vmatpush.msrb.mxu1 %v283_v51  ;;  %v299_v40 = vperm.slane %v297_v39, 0  ;;  %v300_v41 = vperm.slane %v297_v39, 1 }
  0x3d   :  { %251 = vmatpush.msra.mxu3 %v182_v32  ;;  %311 = vmatpush.msrb.mxu0 %v278_v52 }
  0x3e   :  { %232 = vmatpush.msra.mxu2 %v179_v33  ;;  %330 = vmatpush.msrb.mxu1 %v281_v53 }
  0x3f   :  { %252 = vmatpush.msra.mxu3 %v180_v34  ;;  %312 = vmatpush.msrb.mxu0 %v276_v54 }
  0x40   :  { %331 = vmatpush.msrb.mxu1 %v279_v55  ;;  %369 = vmatpush.msrb.mxu2 %v364_v11 }
  0x41   :  { %313 = vmatpush.msrb.mxu0 %v274_v56 }
  0x42   :  { %332 = vmatpush.msrb.mxu1 %v277_v58  ;;  %370 = vmatpush.msrb.mxu2 %v363_v12 }
  0x43   :  { %314 = vmatpush.msrb.mxu0 %v272_v59 }
  0x44   :  { %333 = vmatpush.msrb.mxu1 %v275_v60  ;;  %371 = vmatpush.msrb.mxu2 %v362_v15 }
  0x45   :  { %315 = vmatpush.msrb.mxu0 %v270_v3 }
  0x46   :  { %334 = vmatpush.msrb.mxu1 %v273_v62  ;;  %372 = vmatpush.msrb.mxu2 %v361_v17 }
  0x47   :  { %316 = vmatpush.msrb.mxu0 %v268_v5 }
  0x48   :  { %335 = vmatpush.msrb.mxu1 %v271_v4  ;;  %373 = vmatpush.msrb.mxu2 %v360_v18 }
  0x49   :  { %317 = vmatpush.msrb.mxu0 %v266_v7 }
  0x4a   :  { %336 = vmatpush.msrb.mxu1 %v269_v6  ;;  %374 = vmatpush.msrb.mxu2 %v359_v19 }
  0x4b   :  { %318 = vmatpush.msrb.mxu0 %v264_v9 }
  0x4c   :  { %337 = vmatpush.msrb.mxu1 %v267_v8  ;;  %375 = vmatpush.msrb.mxu2 %v358_v20 }
  0x4e   :  { %338 = vmatpush.msrb.mxu1 %v265_v10  ;;  %376 = vmatpush.msrb.mxu2 %v357_v21 }
  0x50   :  { %377 = vmatpush.msrb.mxu2 %v356_v22 }
  0x52   :  { %378 = vmatpush.msrb.mxu2 %v355_v23 }
  0x54   :  { %379 = vmatpush.msrb.mxu2 %v354_v24 }
  0x56   :  { %380 = vmatpush.msrb.mxu2 %v353_v26 }
  0x58   :  { %381 = vmatpush.msrb.mxu2 %v352_v35 }
  0x5a   :  { %382 = vmatpush.msrb.mxu2 %v351_v36 }
  0x5c   :  { %383 = vmatpush.msrb.mxu2 %v350_v37 }
  0x5e   :  { %384 = vmatpush.msrb.mxu2 %v349_v38 }
  0x9f   :  { %v152_v63 = vpop.f32.mrf.mxu0 }
  0xa0   :  { %v153_v0 = vadd.f32 %v152_v63, %v127_v61 }
  0xa2   :  { %v175_v1 = vmul.f32 0.01, %v153_v0 }
  0xa4   :  { %v176_v2 = vmax.f32 %v153_v0, %v175_v1 }
  0xa6   :  { %178 = vst [vmem:[#allocation14] sm:$0x3] %v176_v2  ;;  %233 = vmatmul.f32.vlgmr.msra.gmra.mxu2 %v176_v2  ;;  %253 = vmatmul.f32.vlgmr.msra.gmra.mxu3 %v176_v2 }
  0xae   :  { %v172_v14 = vpop.f32.mrf.mxu1 }
  0xaf   :  { %v173_v16 = vadd.f32 %v172_v14, %v128_v13 }
  0xb1   :  { %177 = vst [vmem:[#allocation13] sm:$0x3] %v173_v16 }
 0x129   :  { %v234_v29 = vpop.f32.mrf.mxu2  ;;  %v254_v30 = vpop.f32.mrf.mxu3 }
 0x12a   :  { %v235_v31 = vadd.f32 %v234_v29, %v213_v27  ;;  %v255_v32 = vadd.f32 %v254_v30, %v214_v28 }
 0x12c   :  { %v257_v33 = vmul.f32 0.01, %v235_v31  ;;  %260 = vst [vmem:[#allocation13 + $0x2] sm:$0x3] %v255_v32 }
 0x12e   :  { %v258_v34 = vmax.f32 %v235_v31, %v257_v33 }
 0x130   :  { %262 = vst [vmem:[#allocation14 + $0x2] sm:$0x3] %v258_v34  ;;  %319 = vmatmul.f32.vlgmr.msrb.gmra.mxu0 %v258_v34  ;;  %339 = vmatmul.f32.vlgmr.msrb.gmra.mxu1 %v258_v34 }
 0x1ad   :  { %v320_v42 = vpop.f32.mrf.mxu0  ;;  %v340_v43 = vpop.f32.mrf.mxu1 }
 0x1ae   :  { %v321_v44 = vadd.f32 %v320_v42, %v299_v40  ;;  %v341_v45 = vadd.f32 %v340_v43, %v300_v41 }
 0x1b0   :  { %v343_v46 = vmul.f32 0.01, %v321_v44  ;;  %346 = vst [vmem:[#allocation13 + $0x4] sm:$0x3] %v341_v45 }
 0x1b2   :  { %v344_v47 = vmax.f32 %v321_v44, %v343_v46 }
 0x1b4   :  { %348 = vst [vmem:[#allocation14 + $0x4] sm:$0x3] %v344_v47  ;;  %385 = vmatmul.f32.vlgmr.msrb.gmra.mxu2 %v344_v47 }
 0x1b5   :  { %416 = dma.vmem_to_hbm [thread:$0]  %s409_s14, 96, %s411_s17, [#allocation15], %s659_s9, %s659_s9, %s660_s10  }
 0x237   :  { %v386_v49 = vpop.f32.mrf.mxu2 }
 0x238   :  { %v387_v50 = vadd.f32 %v447_v48, %v386_v49 }
 0x23a   :  { %390 = vst [vmem:[#allocation13 + $0x6] sm:$0x3] %v387_v50 }
 0x23b   :  { %403 = dma.vmem_to_hbm [thread:$0]  %s396_s20, 128, %s398_s23, [#allocation4], %s659_s9, %s659_s9, %s660_s10  }
 0x23c   :  { %648 = dma.done.wait [#allocation4], 128  }
 0x23d   :  { %649 = vsyncadd [#allocation4], 4294967168 }
 0x23e   :  { %650 = dma.done.wait [#allocation15], 96  }
 0x23f   :  { %651 = vsyncadd [#allocation15], 4294967200 }
 0x240   :  { %425 = vsyncpa [#allocation3], 1 }
 0x241   :  { %426 = vsyncpa [#allocation6], 1 }
 0x242   :  { %427 = vsyncpa [#allocation9], 1 }
 0x243   :  { %428 = vsyncpa [#allocation12], 1 }
 0x244   :  { %429 = vsyncpa [#allocation4], 1 }
 0x245   :  { %430 = vsyncpa [#allocation15], 1 }

</bundles_post_ra>
